<compile_context>
chip_gen: v5e
topology: v5e:2x2
jax: 0.10.0
libtpu: 0.0.40
codegen_flags: <defaults>
</compile_context>

<pallas_src>
import functools

import jax
import jax.numpy as jnp
from jax import lax
from jax.experimental import pallas as pl
from jax.experimental.pallas import tpu as pltpu


_TILE_BYTES_CAP = 12 * 1024 * 1024   # HBM-facing x tile (per grid step)
_CHUNK_F32_CAP = 1 * 1024 * 1024     # f32 working set per in-kernel chunk


def _ln_chunk(x_ref, o_ref, a, b, seg, start, size, *, eps, feat):
    """LayerNorm rows [start, start+size) of the current VMEM block."""
    x = x_ref[pl.ds(start, size), :].astype(jnp.float32)
    if seg is None:
        # Feature dim == lane dim: plain per-row reduction.
        ssum = jnp.sum(x, axis=-1, keepdims=True)
        mean = ssum * (1.0 / feat)
        diff = x - mean
        sq = jnp.sum(diff * diff, axis=-1, keepdims=True)
    else:
        # k rows packed along lanes: segmented reduction via a block-diagonal
        # 0/1 matrix on the MXU; the result is already broadcast to every lane
        # of its segment.  HIGHEST precision keeps the f32 sums exact.
        ssum = jnp.dot(x, seg, precision=lax.Precision.HIGHEST,
                       preferred_element_type=jnp.float32)
        mean = ssum * (1.0 / feat)
        diff = x - mean
        sq = jnp.dot(diff * diff, seg, precision=lax.Precision.HIGHEST,
                     preferred_element_type=jnp.float32)
    # torch.std default: unbiased (ddof=1); F == 1 gives NaN, matching torch.
    inv_nm1 = (1.0 / (feat - 1)) if feat > 1 else float("nan")
    std = jnp.sqrt(sq * inv_nm1)
    inv = pl.reciprocal(std + eps, approx=False)
    y = a * (diff * inv) + b
    o_ref[pl.ds(start, size), :] = y.astype(o_ref.dtype)


def _run_chunks(x_ref, o_ref, a, b, seg, *, eps, feat, chunk_rows):
    tile_rows = x_ref.shape[0]
    num_full = tile_rows // chunk_rows
    rem = tile_rows - num_full * chunk_rows
    do = functools.partial(_ln_chunk, x_ref, o_ref, a, b, seg,
                           eps=eps, feat=feat)

    if num_full == 1 and rem == 0:        # whole block in one shot
        do(0, chunk_rows)
        return
    if num_full > 0:
        def body(c, carry):
            do(pl.multiple_of(c * chunk_rows, chunk_rows), chunk_rows)
            return carry
        lax.fori_loop(0, num_full, body, 0, unroll=False)
    if rem > 0:                           # static tail chunk
        do(num_full * chunk_rows, rem)


def _ln_kernel(x_ref, a_ref, b_ref, o_ref, *, eps, feat, chunk_rows):
    _run_chunks(x_ref, o_ref, a_ref[...], b_ref[...], None,
                eps=eps, feat=feat, chunk_rows=chunk_rows)


def _ln_packed_kernel(x_ref, seg_ref, a_ref, b_ref, o_ref, *, eps, feat,
                      chunk_rows):
    _run_chunks(x_ref, o_ref, a_ref[...], b_ref[...], seg_ref[...],
                eps=eps, feat=feat, chunk_rows=chunk_rows)


def _pick_tiling(prows, lanes, itemsize):
    """Choose (tile_rows, chunk_rows).

    tile_rows sizes the HBM-facing BlockSpec tile (byte-capped: big tiles
    amortize the ~0.35us/grid-step overhead).  chunk_rows bounds the in-kernel
    f32 working set so widening bf16/int8 tiles never blows VMEM.
    """
    row_mult = max(8, 32 // max(itemsize, 1))      # 8 f32 / 16 bf16 / 32 int8
    row_bytes = max(lanes * itemsize, 1)

    chunk_rows = _CHUNK_F32_CAP // max(lanes * 4, 1)
    chunk_rows = max(min(chunk_rows, 1024), row_mult)
    chunk_rows = (chunk_rows // row_mult) * row_mult

    tile_rows = max(_TILE_BYTES_CAP // row_bytes, chunk_rows)
    tile_rows = (tile_rows // chunk_rows) * chunk_rows

    if tile_rows >= prows:
        # Whole problem fits in one tile; split in two when there is enough
        # work so both of v7x's TensorCores get a share.
        half = -(-prows // 2)
        half = -(-half // row_mult) * row_mult
        if prows >= 2 * row_mult and half < prows:
            tile_rows = half
        else:
            tile_rows = prows
        chunk_rows = min(chunk_rows, tile_rows)
        return tile_rows, chunk_rows

    # Best effort: even grid length so the 1-D parallel grid balances across
    # v7x's two TensorCores (odd grids leave one core a tile short).
    num_tiles = -(-prows // tile_rows)
    if num_tiles % 2 == 1:
        cand = -(-prows // (num_tiles + 1))
        cand = -(-cand // chunk_rows) * chunk_rows
        if chunk_rows <= cand <= tile_rows and (-(-prows // cand)) % 2 == 0:
            tile_rows = cand
    return tile_rows, chunk_rows


def layer_norm(x, a_2, b_2, eps=1e-6):
    """x: (..., F); a_2, b_2: (F,). Returns same shape/dtype as x."""
    orig_shape = x.shape
    feat = int(orig_shape[-1])
    rows = 1
    for d in orig_shape[:-1]:
        rows *= int(d)
    if rows == 0 or feat == 0:
        return x

    itemsize = jnp.dtype(x.dtype).itemsize

    def run(pack):
        lanes = feat * pack
        prows = rows // pack
        x2 = x.reshape(prows, lanes)

        a2 = a_2.reshape(1, feat).astype(jnp.float32)
        b2 = b_2.reshape(1, feat).astype(jnp.float32)
        if pack > 1:
            a2 = jnp.tile(a2, (1, pack))
            b2 = jnp.tile(b2, (1, pack))

        tile_rows, chunk_rows = _pick_tiling(prows, lanes, itemsize)
        grid = (pl.cdiv(prows, tile_rows),)

        # VMEM: in/out double-buffered + bounded f32 chunk temps + params.
        tile_bytes = tile_rows * lanes * itemsize
        chunk_f32 = chunk_rows * lanes * 4
        seg_bytes = 2 * lanes * lanes * 4 if pack > 1 else 0
        needed = (4 * tile_bytes + 6 * chunk_f32 + 4 * lanes * 4
                  + seg_bytes + (2 << 20))
        vmem_limit = int(min(max(needed, 32 << 20), 64 << 20))

        x_spec = pl.BlockSpec((tile_rows, lanes), lambda i: (i, 0))
        p_spec = pl.BlockSpec((1, lanes), lambda i: (0, 0))
        o_spec = pl.BlockSpec((tile_rows, lanes), lambda i: (i, 0))
        cparams = pltpu.CompilerParams(
            dimension_semantics=("parallel",),   # shards rows over v7x's 2 TCs
            vmem_limit_bytes=vmem_limit,
        )
        common = dict(eps=float(eps), feat=feat, chunk_rows=chunk_rows)

        if pack > 1:
            lane_seg = jnp.arange(lanes, dtype=jnp.int32) // feat
            seg = (lane_seg[:, None] == lane_seg[None, :]).astype(jnp.float32)
            out2 = pl.pallas_call(
                functools.partial(_ln_packed_kernel, **common),
                out_shape=jax.ShapeDtypeStruct((prows, lanes), x.dtype),
                grid_spec=pl.GridSpec(
                    grid=grid,
                    in_specs=[x_spec,
                              pl.BlockSpec((lanes, lanes), lambda i: (0, 0)),
                              p_spec, p_spec],
                    out_specs=o_spec,
                ),
                compiler_params=cparams,
            )(x2, seg, a2, b2)
        else:
            out2 = pl.pallas_call(
                functools.partial(_ln_kernel, **common),
                out_shape=jax.ShapeDtypeStruct((prows, lanes), x.dtype),
                grid_spec=pl.GridSpec(
                    grid=grid,
                    in_specs=[x_spec, p_spec, p_spec],
                    out_specs=o_spec,
                ),
                compiler_params=cparams,
            )(x2, a2, b2)
        return out2.reshape(orig_shape)

    # Lane packing for small feature dims: view (rows, F) as (rows/k, k*F) so
    # stores are lane-dense (F=32 -> 4 rows per 128-lane register).
    pack = 1
    if 2 <= feat < 128 and 128 % feat == 0 and rows % (128 // feat) == 0:
        pack = 128 // feat

    if pack > 1:
        try:
            return run(pack)
        except Exception:
            # Portability guard: fall back to the known-good unpacked path if
            # the MXU-based segmented reduction fails to lower on some target.
            return run(1)
    return run(1)


def layer_norm_ref(x, a_2, b_2, eps=1e-6):
    """Pure-JAX reference matching the PyTorch module exactly."""
    xf = x.astype(jnp.float32)
    mean = jnp.mean(xf, axis=-1, keepdims=True)
    std = jnp.std(xf, axis=-1, keepdims=True, ddof=1)   # torch.std default
    return (a_2 * (xf - mean) / (std + eps) + b_2).astype(x.dtype)


if __name__ == "__main__":
    key = jax.random.PRNGKey(0)
    batch, seq, hidden = 2, 8, 32

    x = jax.random.normal(key, (batch, seq, hidden), dtype=jnp.float32)

    # nn.Parameter(torch.ones(features)) / torch.zeros(features)
    a_2 = jnp.ones((hidden,), dtype=jnp.float32)
    b_2 = jnp.zeros((hidden,), dtype=jnp.float32)

    out = layer_norm(x, a_2, b_2, eps=1e-6)
    out = jax.block_until_ready(out)

    ref = layer_norm_ref(x, a_2, b_2, eps=1e-6)
    assert out.shape == x.shape and out.dtype == x.dtype
    assert jnp.max(jnp.abs(out - ref)) < 1e-5, "mismatch vs reference"

    print("KERNEL_OK")
</pallas_src>

<mosaic_0001>
module attributes {stable_mosaic.version = 11 : i64} {
  func.func @_ln_packed_kernel(%arg0: i32, %arg1: memref<4x128xf32, #tpu.memory_space<vmem>>, %arg2: memref<128x128xf32, #tpu.memory_space<vmem>>, %arg3: memref<1x128xf32, #tpu.memory_space<vmem>>, %arg4: memref<1x128xf32, #tpu.memory_space<vmem>>, %arg5: memref<4x128xf32, #tpu.memory_space<vmem>>) attributes {dimension_semantics = [#tpu.dimension_semantics<parallel>], iteration_bounds = array<i64: 1>, scalar_prefetch = 0 : i64, scratch_operands = 0 : i64, tpu.core_type = #tpu.core_type<tc>, window_params = [{transform_indices = @transform_0, window_bounds = array<i64: 4, 128>}, {pipeline_mode = #tpu.pipeline_mode<synchronous>, transform_indices = @transform_1, window_bounds = array<i64: 128, 128>}, {pipeline_mode = #tpu.pipeline_mode<synchronous>, transform_indices = @transform_2, window_bounds = array<i64: 1, 128>}, {pipeline_mode = #tpu.pipeline_mode<synchronous>, transform_indices = @transform_3, window_bounds = array<i64: 1, 128>}, {transform_indices = @transform_4, window_bounds = array<i64: 4, 128>}]} {
    %c0 = arith.constant 0 : index
    %c0_0 = arith.constant 0 : index
    %0 = vector.load %arg3[%c0, %c0_0] : memref<1x128xf32, #tpu.memory_space<vmem>>, vector<1x128xf32>
    %c0_1 = arith.constant 0 : index
    %c0_2 = arith.constant 0 : index
    %1 = vector.load %arg4[%c0_1, %c0_2] : memref<1x128xf32, #tpu.memory_space<vmem>>, vector<1x128xf32>
    %c0_3 = arith.constant 0 : index
    %c0_4 = arith.constant 0 : index
    %2 = vector.load %arg2[%c0_3, %c0_4] : memref<128x128xf32, #tpu.memory_space<vmem>>, vector<128x128xf32>
    %c0_5 = arith.constant 0 : index
    %c0_6 = arith.constant 0 : index
    %3 = vector.load %arg1[%c0_5, %c0_6] : memref<4x128xf32, #tpu.memory_space<vmem>>, vector<4x128xf32>
    %cst = arith.constant dense<0.000000e+00> : vector<4x128xf32>
    %4 = tpu.matmul %3, %2, %cst {dimension_numbers = #tpu.dot_dimension_numbers<[1], [0], [0], [1], [0, 0, 1, 1], [], []>, precision = #tpu.contract_precision<fp32>} : vector<4x128xf32>, vector<128x128xf32>, vector<4x128xf32> -> vector<4x128xf32>
    %cst_7 = arith.constant 3.125000e-02 : f32
    %5 = vector.broadcast %cst_7 : f32 to vector<4x128xf32>
    %6 = arith.mulf %4, %5 : vector<4x128xf32>
    %7 = arith.subf %3, %6 : vector<4x128xf32>
    %8 = arith.mulf %7, %7 : vector<4x128xf32>
    %cst_8 = arith.constant dense<0.000000e+00> : vector<4x128xf32>
    %9 = tpu.matmul %8, %2, %cst_8 {dimension_numbers = #tpu.dot_dimension_numbers<[1], [0], [0], [1], [0, 0, 1, 1], [], []>, precision = #tpu.contract_precision<fp32>} : vector<4x128xf32>, vector<128x128xf32>, vector<4x128xf32> -> vector<4x128xf32>
    %cst_9 = arith.constant 0.0322580636 : f32
    %10 = vector.broadcast %cst_9 : f32 to vector<4x128xf32>
    %11 = arith.mulf %9, %10 : vector<4x128xf32>
    %12 = math.sqrt %11 : vector<4x128xf32>
    %cst_10 = arith.constant 9.99999997E-7 : f32
    %13 = vector.broadcast %cst_10 : f32 to vector<4x128xf32>
    %14 = arith.addf %12, %13 : vector<4x128xf32>
    %15 = tpu.reciprocal %14 : vector<4x128xf32> -> vector<4x128xf32>
    %16 = arith.mulf %7, %15 : vector<4x128xf32>
    %17 = vector.broadcast %0 : vector<1x128xf32> to vector<4x128xf32>
    %18 = arith.mulf %17, %16 : vector<4x128xf32>
    %19 = vector.broadcast %1 : vector<1x128xf32> to vector<4x128xf32>
    %20 = arith.addf %18, %19 : vector<4x128xf32>
    %c0_11 = arith.constant 0 : index
    %c0_12 = arith.constant 0 : index
    %21 = vector.load %arg5[%c0_11, %c0_12] : memref<4x128xf32, #tpu.memory_space<vmem>>, vector<4x128xf32>
    tpu.vector_store %arg5[%c0_11, %c0_12], %20 {strides = array<i32>} : memref<4x128xf32, #tpu.memory_space<vmem>>, vector<4x128xf32>,
    return
  }
  func.func @transform_0(%arg0: i32) -> (i32, i32) {
    %c0_i32 = arith.constant 0 : i32
    %c0_i32_0 = arith.constant 0 : i32
    return %arg0, %c0_i32 : i32, i32
  }
  func.func @transform_1(%arg0: i32) -> (i32, i32) {
    %c0_i32 = arith.constant 0 : i32
    %c0_i32_0 = arith.constant 0 : i32
    %c0_i32_1 = arith.constant 0 : i32
    return %c0_i32, %c0_i32_0 : i32, i32
  }
  func.func @transform_2(%arg0: i32) -> (i32, i32) {
    %c0_i32 = arith.constant 0 : i32
    %c0_i32_0 = arith.constant 0 : i32
    %c0_i32_1 = arith.constant 0 : i32
    return %c0_i32, %c0_i32_0 : i32, i32
  }
  func.func @transform_3(%arg0: i32) -> (i32, i32) {
    %c0_i32 = arith.constant 0 : i32
    %c0_i32_0 = arith.constant 0 : i32
    %c0_i32_1 = arith.constant 0 : i32
    return %c0_i32, %c0_i32_0 : i32, i32
  }
  func.func @transform_4(%arg0: i32) -> (i32, i32) {
    %c0_i32 = arith.constant 0 : i32
    %c0_i32_0 = arith.constant 0 : i32
    return %arg0, %c0_i32 : i32, i32
  }
}

module attributes {stable_mosaic.version = 11 : i64} {
  func.func @_ln_kernel(%arg0: i32, %arg1: memref<8x32xf32, #tpu.memory_space<vmem>>, %arg2: memref<1x32xf32, #tpu.memory_space<vmem>>, %arg3: memref<1x32xf32, #tpu.memory_space<vmem>>, %arg4: memref<8x32xf32, #tpu.memory_space<vmem>>) attributes {dimension_semantics = [#tpu.dimension_semantics<parallel>], iteration_bounds = array<i64: 2>, scalar_prefetch = 0 : i64, scratch_operands = 0 : i64, tpu.core_type = #tpu.core_type<tc>, window_params = [{transform_indices = @transform_0, window_bounds = array<i64: 8, 32>}, {pipeline_mode = #tpu.pipeline_mode<synchronous>, transform_indices = @transform_1, window_bounds = array<i64: 1, 32>}, {pipeline_mode = #tpu.pipeline_mode<synchronous>, transform_indices = @transform_2, window_bounds = array<i64: 1, 32>}, {transform_indices = @transform_3, window_bounds = array<i64: 8, 32>}]} {
    %c0 = arith.constant 0 : index
    %c0_0 = arith.constant 0 : index
    %0 = vector.load %arg2[%c0, %c0_0] : memref<1x32xf32, #tpu.memory_space<vmem>>, vector<1x32xf32>
    %c0_1 = arith.constant 0 : index
    %c0_2 = arith.constant 0 : index
    %1 = vector.load %arg3[%c0_1, %c0_2] : memref<1x32xf32, #tpu.memory_space<vmem>>, vector<1x32xf32>
    %c0_3 = arith.constant 0 : index
    %c0_4 = arith.constant 0 : index
    %2 = vector.load %arg1[%c0_3, %c0_4] : memref<8x32xf32, #tpu.memory_space<vmem>>, vector<8x32xf32>
    %cst = arith.constant dense<0.000000e+00> : vector<8xf32>
    %3 = vector.multi_reduction <add>, %2, %cst [1] : vector<8x32xf32> to vector<8xf32>
    %4 = vector.shape_cast %3 : vector<8xf32> to vector<8x1xf32>
    %cst_5 = arith.constant 3.125000e-02 : f32
    %5 = vector.broadcast %cst_5 : f32 to vector<8x1xf32>
    %6 = arith.mulf %4, %5 : vector<8x1xf32>
    %7 = vector.broadcast %6 : vector<8x1xf32> to vector<8x32xf32>
    %8 = arith.subf %2, %7 : vector<8x32xf32>
    %9 = arith.mulf %8, %8 : vector<8x32xf32>
    %cst_6 = arith.constant dense<0.000000e+00> : vector<8xf32>
    %10 = vector.multi_reduction <add>, %9, %cst_6 [1] : vector<8x32xf32> to vector<8xf32>
    %11 = vector.shape_cast %10 : vector<8xf32> to vector<8x1xf32>
    %cst_7 = arith.constant 0.0322580636 : f32
    %12 = vector.broadcast %cst_7 : f32 to vector<8x1xf32>
    %13 = arith.mulf %11, %12 : vector<8x1xf32>
    %14 = math.sqrt %13 : vector<8x1xf32>
    %cst_8 = arith.constant 9.99999997E-7 : f32
    %15 = vector.broadcast %cst_8 : f32 to vector<8x1xf32>
    %16 = arith.addf %14, %15 : vector<8x1xf32>
    %17 = tpu.reciprocal %16 : vector<8x1xf32> -> vector<8x1xf32>
    %18 = vector.broadcast %17 : vector<8x1xf32> to vector<8x32xf32>
    %19 = arith.mulf %8, %18 : vector<8x32xf32>
    %20 = vector.broadcast %0 : vector<1x32xf32> to vector<8x32xf32>
    %21 = arith.mulf %20, %19 : vector<8x32xf32>
    %22 = vector.broadcast %1 : vector<1x32xf32> to vector<8x32xf32>
    %23 = arith.addf %21, %22 : vector<8x32xf32>
    %c0_9 = arith.constant 0 : index
    %c0_10 = arith.constant 0 : index
    %24 = vector.load %arg4[%c0_9, %c0_10] : memref<8x32xf32, #tpu.memory_space<vmem>>, vector<8x32xf32>
    tpu.vector_store %arg4[%c0_9, %c0_10], %23 {strides = array<i32>} : memref<8x32xf32, #tpu.memory_space<vmem>>, vector<8x32xf32>,
    return
  }
  func.func @transform_0(%arg0: i32) -> (i32, i32) {
    %c0_i32 = arith.constant 0 : i32
    %c0_i32_0 = arith.constant 0 : i32
    return %arg0, %c0_i32 : i32, i32
  }
  func.func @transform_1(%arg0: i32) -> (i32, i32) {
    %c0_i32 = arith.constant 0 : i32
    %c0_i32_0 = arith.constant 0 : i32
    %c0_i32_1 = arith.constant 0 : i32
    return %c0_i32, %c0_i32_0 : i32, i32
  }
  func.func @transform_2(%arg0: i32) -> (i32, i32) {
    %c0_i32 = arith.constant 0 : i32
    %c0_i32_0 = arith.constant 0 : i32
    %c0_i32_1 = arith.constant 0 : i32
    return %c0_i32, %c0_i32_0 : i32, i32
  }
  func.func @transform_3(%arg0: i32) -> (i32, i32) {
    %c0_i32 = arith.constant 0 : i32
    %c0_i32_0 = arith.constant 0 : i32
    return %arg0, %c0_i32 : i32, i32
  }
}

</mosaic_0001>

<bundles_post_ra>
// kernel: tpu_custom_call.1
= control target key start
LH: loop header
LB: loop body
LE: loop exit
PB: predicated region body
PF: predicated region fallthrough
CT: control target
= control target key end

     0   :  { %9 = vsyncpa [#allocation3], 0  ;;  %s1337_s0 = inlined_call_operand.hbm [shape: f32[4,128], index: 0, kind: input, shape index: {}]   ;;  %s1338_s1 = inlined_call_operand.hbm [shape: f32[128,128], index: 1, kind: input, shape index: {}]   ;;  %s1339_s2 = inlined_call_operand.vmem [shape: f32[1,128], index: 2, kind: input, shape index: {}]   ;;  %s1340_s3 = inlined_call_operand.vmem [shape: f32[1,128], index: 3, kind: input, shape index: {}]   ;;  %s1341_s4 = inlined_call_operand.hbm [shape: f32[4,128], index: 4, kind: output, shape index: {}]  }
   0x1   :  { %10 = vsyncpa [#allocation6], 0 }
   0x2   :  { %11 = vsyncpa [#allocation4], 0  ;;  %s17_s17 = sshll.u32 %s1337_s0, 4  ;;  %s897_s18 = smov [#allocation2]   ;;  %s18_s17 = int_to_ptr.hbm [resolvable:$true] %s17_s17 }
   0x3   :  { %s19_s19 = sshll.u32 %s897_s18, 4  ;;  %s27_s22 = sshll.u32 %s1338_s1, 4  ;;  %s20_s19 = int_to_ptr.vmem [resolvable:$true] %s19_s19  ;;  %s28_s22 = int_to_ptr.hbm [resolvable:$true] %s27_s22 }
   0x4   :  { %22 = dma.hbm_to_vmem [thread:$0]  %s18_s17, 64, %s20_s19, [#allocation3]  }
   0x5   :  { %s898_s23 = smov [#allocation5]   ;;  %s899_s25 = smov 128  }
   0x6   :  { %s29_s24 = sshll.u32 %s898_s23, 4  ;;  %s900_s26 = smov 8   ;;  %s30_s24 = int_to_ptr.vmem [resolvable:$true] %s29_s24 }
   0x7   :  { %35 = dma.hbm_to_vmem [thread:$0]  %s28_s22, 2048, %s30_s24, [#allocation6], %s899_s25, %s899_s25, %s900_s26  }
   0x8   :  { %891 = dma.done.wait [#allocation3], 64  }
   0x9   :  { %892 = vsyncadd [#allocation3], 4294967232 }
   0xa   :  { %893 = dma.done.wait [#allocation6], 2048  }
   0xb   :  { %894 = vsyncadd [#allocation6], 4294965248  ;;  %v65_v0 = vld [vmem:[#allocation5 + $0x78] sm:$0xff]  ;;  %v64_v1 = vld [vmem:[#allocation5 + $0x70] sm:$0xff]  ;;  %s901_s29 = smov [#allocation7]   ;;  %s797_s7 = sshll.u32 %s1341_s4, 4  ;;  %s798_s7 = int_to_ptr.hbm [resolvable:$true] %s797_s7 }
   0xc   :  { %v63_v2 = vld [vmem:[#allocation5 + $0x68] sm:$0xff]  ;;  %v933_v3 = vand.u32 4294901760, %v65_v0  ;;  %v935_v4 = vand.u32 4294901760, %v64_v1  ;;  %v62_v6 = vld [vmem:[#allocation5 + $0x60] sm:$0xff]  ;;  %v61_v7 = vld [vmem:[#allocation5 + $0x58] sm:$0xff]  ;;  %s795_s30 = sshll.u32 %s901_s29, 4  ;;  %s796_s30 = int_to_ptr.vmem [resolvable:$true] %s795_s30 }
   0xd   :  { %v937_v5 = vand.u32 4294901760, %v63_v2  ;;  %v60_v8 = vld [vmem:[#allocation5 + $0x50] sm:$0xff]  ;;  %v939_v9 = vand.u32 4294901760, %v62_v6  ;;  %v941_v10 = vand.u32 4294901760, %v61_v7  ;;  %v59_v12 = vld [vmem:[#allocation5 + $0x48] sm:$0xff]  ;;  %v58_v13 = vld [vmem:[#allocation5 + $0x40] sm:$0xff] }
   0xe   :  { %v943_v11 = vand.u32 4294901760, %v60_v8  ;;  %68 = vmatpush.msra.mxu0 %v933_v3  ;;  %v947_v14 = vsub.f32 %v65_v0, %v933_v3  ;;  %v950_v15 = vsub.f32 %v64_v1, %v935_v4  ;;  %v955_v17 = vand.u32 4294901760, %v59_v12  ;;  %v57_v18 = vld [vmem:[#allocation5 + $0x38] sm:$0xff]  ;;  %264 = vmatpush.msra.mxu3 %v933_v3  ;;  %v56_v26 = vld [vmem:[#allocation5 + $0x30] sm:$0xff]  ;;  %v55_v36 = vld [vmem:[#allocation5 + $0x28] sm:$0xff] }
   0xf   :  { %v953_v16 = vsub.f32 %v63_v2, %v937_v5  ;;  %v959_v19 = vsub.f32 %v62_v6, %v939_v9  ;;  %v962_v20 = vsub.f32 %v61_v7, %v941_v10  ;;  %v977_v25 = vand.u32 4294901760, %v58_v13  ;;  %v54_v42 = vld [vmem:[#allocation5 + $0x20] sm:$0xff]  ;;  %v53_v47 = vld [vmem:[#allocation5 + $0x18] sm:$0xff]  ;;  %v52_v55 = vld [vmem:[#allocation5 + $0x10] sm:$0xff] }
  0x10   :  { %v965_v21 = vsub.f32 %v60_v8, %v943_v11  ;;  %70 = vmatpush.msra.mxu0 %v935_v4  ;;  %v969_v22 = vand.u32 4294901760, %v947_v14  ;;  %v972_v23 = vand.u32 4294901760, %v950_v15  ;;  %211 = vmatpush.msra.mxu2 %v947_v14  ;;  %v983_v28 = vand.u32 4294901760, %v57_v18  ;;  %v51_v60 = vld [vmem:[#allocation5 + $0x8] sm:$0xff]  ;;  %v50_v1 = vld [vmem:[#allocation5] sm:$0xff] }
  0x11   :  { %v975_v24 = vand.u32 4294901760, %v953_v16  ;;  %v981_v27 = vand.u32 4294901760, %v959_v19  ;;  %v986_v29 = vsub.f32 %v59_v12, %v955_v17  ;;  %266 = vmatpush.msra.mxu3 %v935_v4  ;;  %v997_v33 = vand.u32 4294901760, %v962_v20  ;;  %v1087_v7 = vld [vmem:[#allocation2] sm:$0xf] }
  0x12   :  { %72 = vmatpush.msra.mxu0 %v937_v5  ;;  %v111_v30 = vsub.f32 %v947_v14, %v969_v22  ;;  %v117_v31 = vsub.f32 %v950_v15, %v972_v23  ;;  %214 = vmatpush.msra.mxu2 %v950_v15  ;;  %v1001_v34 = vand.u32 4294901760, %v965_v21  ;;  %v1003_v35 = vand.u32 4294901760, %v56_v26  ;;  %1356 = vst [vmem:[#allocation17_spill] sm:$0xff] %v1087_v7 }
  0x13   :  { %v123_v32 = vsub.f32 %v953_v16, %v975_v24  ;;  %268 = vmatpush.msra.mxu3 %v937_v5  ;;  %v129_v39 = vsub.f32 %v959_v19, %v981_v27  ;;  %v1014_v40 = vsub.f32 %v58_v13, %v977_v25  ;;  %v1018_v41 = vand.u32 4294901760, %v986_v29 }
  0x14   :  { %v1006_v37 = vand.u32 4294901760, %v111_v30  ;;  %74 = vmatpush.msra.mxu0 %v939_v9  ;;  %v1009_v38 = vand.u32 4294901760, %v117_v31  ;;  %217 = vmatpush.msra.mxu2 %v953_v16  ;;  %v135_v44 = vsub.f32 %v962_v20, %v997_v33  ;;  %v1027_v45 = vand.u32 4294901760, %v55_v36 }
  0x15   :  { %1350 = vst [vmem:[#allocation11_spill] sm:$0xff] %v1014_v40  ;;  %270 = vmatpush.msra.mxu3 %v939_v9  ;;  %v1023_v43 = vand.u32 4294901760, %v123_v32  ;;  %v1030_v46 = vsub.f32 %v57_v18, %v983_v28  ;;  %v141_v48 = vsub.f32 %v965_v21, %v1001_v34  ;;  %v1038_v49 = vand.u32 4294901760, %v129_v39 }
  0x16   :  { %113 = vmatpush.msra.mxu1 %v1006_v37  ;;  %76 = vmatpush.msra.mxu0 %v941_v10  ;;  %v1041_v50 = vand.u32 4294901760, %v1014_v40  ;;  %v1043_v51 = vand.u32 4294901760, %v54_v42  ;;  %v1046_v52 = vsub.f32 %v56_v26, %v1003_v35  ;;  %v147_v53 = vsub.f32 %v986_v29, %v1018_v41 }
  0x17   :  { %1351 = vst [vmem:[#allocation12_spill] sm:$0xff] %v1030_v46  ;;  %220 = vmatpush.msra.mxu2 %v959_v19  ;;  %272 = vmatpush.msra.mxu3 %v941_v10  ;;  %v1050_v54 = vand.u32 4294901760, %v53_v47  ;;  %v1056_v56 = vand.u32 4294901760, %v135_v44  ;;  %v1059_v57 = vand.u32 4294901760, %v1030_v46  ;;  %v1062_v58 = vsub.f32 %v55_v36, %v1027_v45 }
  0x18   :  { %119 = vmatpush.msra.mxu1 %v1009_v38  ;;  %78 = vmatpush.msra.mxu0 %v943_v11  ;;  %1352 = vst [vmem:[#allocation13_spill] sm:$0xff] %v1046_v52  ;;  %v1064_v59 = vand.u32 4294901760, %v141_v48  ;;  %v153_v61 = vsub.f32 %v1014_v40, %v1041_v50  ;;  %v1073_v62 = vand.u32 4294901760, %v1046_v52  ;;  %v1075_v63 = vand.u32 4294901760, %v52_v55 }
  0x19   :  { %223 = vmatpush.msra.mxu2 %v962_v20  ;;  %274 = vmatpush.msra.mxu3 %v943_v11  ;;  %1353 = vst [vmem:[#allocation14_spill] sm:$0xff] %v1062_v58  ;;  %v1078_v0 = vsub.f32 %v54_v42, %v1043_v51  ;;  %v1080_v2 = vand.u32 4294901760, %v147_v53  ;;  %v1083_v6 = vsub.f32 %v53_v47, %v1050_v54  ;;  %v1094_v12 = vand.u32 4294901760, %v1062_v58 }
  0x1a   :  { %125 = vmatpush.msra.mxu1 %v1023_v43  ;;  %80 = vmatpush.msra.mxu0 %v955_v17  ;;  %v159_v8 = vsub.f32 %v1030_v46, %v1059_v57  ;;  %v1096_v13 = vand.u32 4294901760, %v51_v60  ;;  %v1099_v18 = vand.u32 4294901760, %v1087_v7  ;;  %v1101_v26 = vand.u32 4294901760, %v50_v1 }
  0x1b   :  { %226 = vmatpush.msra.mxu2 %v965_v21  ;;  %276 = vmatpush.msra.mxu3 %v955_v17  ;;  %1354 = vst [vmem:[#allocation15_spill] sm:$0xff] %v1078_v0  ;;  %v1107_v30 = vand.u32 4294901760, %v153_v61  ;;  %v165_v31 = vsub.f32 %v1046_v52, %v1073_v62  ;;  %v1112_v32 = vand.u32 4294901760, %v1078_v0  ;;  %v1115_v36 = vsub.f32 %v52_v55, %v1075_v63 }
  0x1c   :  { %131 = vmatpush.msra.mxu1 %v1038_v49  ;;  %82 = vmatpush.msra.mxu0 %v977_v25  ;;  %1355 = vst [vmem:[#allocation16_spill] sm:$0xff] %v1083_v6  ;;  %v1118_v39 = vand.u32 4294901760, %v1083_v6  ;;  %v1124_v42 = vand.u32 4294901760, %v159_v8  ;;  %v171_v44 = vsub.f32 %v1062_v58, %v1094_v12  ;;  %v1129_v47 = vsub.f32 %v51_v60, %v1096_v13 }
  0x1d   :  { %229 = vmatpush.msra.mxu2 %v986_v29  ;;  %278 = vmatpush.msra.mxu3 %v977_v25  ;;  %1357 = vst [vmem:[#allocation18_spill] sm:$0xff] %v1115_v36  ;;  %v100_v48 = vsub.f32 %v1087_v7, %v1099_v18  ;;  %v1137_v53 = vand.u32 4294901760, %v165_v31  ;;  %v177_v55 = vsub.f32 %v1078_v0, %v1112_v32  ;;  %v1142_v61 = vand.u32 4294901760, %v1115_v36 }
  0x1e   :  { %137 = vmatpush.msra.mxu1 %v1056_v56  ;;  %84 = vmatpush.msra.mxu0 %v983_v28  ;;  %v1145_v60 = vsub.f32 %v50_v1, %v1101_v26  ;;  %v1151_v8 = vand.u32 4294901760, %v171_v44  ;;  %v183_v31 = vsub.f32 %v1083_v6, %v1118_v39  ;;  %v1156_v7 = vand.u32 4294901760, %v1129_v47 }
  0x1f   :  { %232 = vmatpush.msra.mxu2 %v1014_v40  ;;  %280 = vmatpush.msra.mxu3 %v983_v28  ;;  %v1162_v1 = vand.u32 4294901760, %v177_v55  ;;  %v189_v44 = vsub.f32 %v1115_v36, %v1142_v61 }
  0x20   :  { %143 = vmatpush.msra.mxu1 %v1064_v59  ;;  %86 = vmatpush.msra.mxu0 %v1003_v35  ;;  %v195_v55 = vsub.f32 %v1129_v47, %v1156_v7 }
  0x21   :  { %235 = vmatpush.msra.mxu2 %v1030_v46  ;;  %282 = vmatpush.msra.mxu3 %v1003_v35 }
  0x22   :  { %149 = vmatpush.msra.mxu1 %v1080_v2  ;;  %88 = vmatpush.msra.mxu0 %v1027_v45 }
  0x23   :  { %238 = vmatpush.msra.mxu2 %v1046_v52  ;;  %284 = vmatpush.msra.mxu3 %v1027_v45  ;;  %v101_v52 = vand.u32 4294901760, %v100_v48 }
  0x24   :  { %155 = vmatpush.msra.mxu1 %v1107_v30  ;;  %90 = vmatpush.msra.mxu0 %v1043_v51 }
  0x25   :  { %241 = vmatpush.msra.mxu2 %v1062_v58  ;;  %286 = vmatpush.msra.mxu3 %v1043_v51  ;;  %v1167_v58 = vand.u32 4294901760, %v1145_v60  ;;  %v102_v46 = vsub.f32 %v100_v48, %v101_v52 }
  0x26   :  { %161 = vmatpush.msra.mxu1 %v1124_v42  ;;  %92 = vmatpush.msra.mxu0 %v1050_v54 }
  0x27   :  { %244 = vmatpush.msra.mxu2 %v1078_v0  ;;  %288 = vmatpush.msra.mxu3 %v1050_v54  ;;  %v1173_v0 = vand.u32 4294901760, %v183_v31  ;;  %v201_v40 = vsub.f32 %v1145_v60, %v1167_v58  ;;  %v1188_v31 = vand.u32 4294901760, %v195_v55 }
  0x28   :  { %167 = vmatpush.msra.mxu1 %v1137_v53  ;;  %94 = vmatpush.msra.mxu0 %v1075_v63 }
  0x29   :  { %247 = vmatpush.msra.mxu2 %v1083_v6  ;;  %290 = vmatpush.msra.mxu3 %v1075_v63  ;;  %v1181_v6 = vand.u32 4294901760, %v189_v44  ;;  %v1194_v44 = vand.u32 4294901760, %v201_v40 }
  0x2a   :  { %173 = vmatpush.msra.mxu1 %v1151_v8  ;;  %96 = vmatpush.msra.mxu0 %v1096_v13 }
  0x2b   :  { %250 = vmatpush.msra.mxu2 %v1115_v36  ;;  %292 = vmatpush.msra.mxu3 %v1096_v13  ;;  %v103_v36 = vand.u32 4294901760, %v102_v46 }
  0x2c   :  { %179 = vmatpush.msra.mxu1 %v1162_v1  ;;  %98 = vmatpush.msra.mxu0 %v1101_v26 }
  0x2d   :  { %253 = vmatpush.msra.mxu2 %v1129_v47  ;;  %294 = vmatpush.msra.mxu3 %v1101_v26 }
  0x2e   :  { %305 = vmatpush.msrb.mxu0 %v969_v22  ;;  %185 = vmatpush.msra.mxu1 %v1173_v0 }
  0x2f   :  { %256 = vmatpush.msra.mxu2 %v1145_v60  ;;  %298 = vmatmul.f32.vlgmr.msra.gmra.mxu3 %v101_v52 }
  0x30   :  { %309 = vmatpush.msrb.mxu0 %v972_v23  ;;  %191 = vmatpush.msra.mxu1 %v1181_v6 }
  0x31   :  { %259 = vmatmul.f32.vlgmr.msra.gmra.mxu2 %v100_v48  ;;  %104 = vmatmul.f32.vlgmr.msra.gmra.mxu0 %v103_v36 }
  0x32   :  { %313 = vmatpush.msrb.mxu0 %v975_v24  ;;  %197 = vmatpush.msra.mxu1 %v1188_v31 }
  0x33   :  { %457 = vmatpush.msrb.mxu3 %v1006_v37  ;;  %412 = vmatpush.msrb.mxu2 %v933_v3 }
  0x34   :  { %317 = vmatpush.msrb.mxu0 %v981_v27  ;;  %203 = vmatpush.msra.mxu1 %v1194_v44 }
  0x35   :  { %205 = vmatmul.f32.vlgmr.msra.gmra.mxu1 %v1099_v18  ;;  %463 = vmatpush.msrb.mxu3 %v1009_v38 }
  0x36   :  { %372 = vmatpush.msrb.mxu1 %v933_v3  ;;  %321 = vmatpush.msrb.mxu0 %v997_v33 }
  0x37   :  { %469 = vmatpush.msrb.mxu3 %v1023_v43  ;;  %414 = vmatpush.msrb.mxu2 %v935_v4 }
  0x38   :  { %374 = vmatpush.msrb.mxu1 %v935_v4  ;;  %325 = vmatpush.msrb.mxu0 %v1001_v34 }
  0x39   :  { %475 = vmatpush.msrb.mxu3 %v1038_v49  ;;  %416 = vmatpush.msrb.mxu2 %v937_v5 }
  0x3a   :  { %376 = vmatpush.msrb.mxu1 %v937_v5  ;;  %329 = vmatpush.msrb.mxu0 %v1018_v41 }
  0x3b   :  { %481 = vmatpush.msrb.mxu3 %v1056_v56  ;;  %418 = vmatpush.msrb.mxu2 %v939_v9 }
  0x3c   :  { %378 = vmatpush.msrb.mxu1 %v939_v9  ;;  %333 = vmatpush.msrb.mxu0 %v1041_v50 }
  0x3d   :  { %487 = vmatpush.msrb.mxu3 %v1064_v59  ;;  %420 = vmatpush.msrb.mxu2 %v941_v10 }
  0x3e   :  { %380 = vmatpush.msrb.mxu1 %v941_v10  ;;  %337 = vmatpush.msrb.mxu0 %v1059_v57 }
  0x3f   :  { %493 = vmatpush.msrb.mxu3 %v1080_v2  ;;  %422 = vmatpush.msrb.mxu2 %v943_v11 }
  0x40   :  { %382 = vmatpush.msrb.mxu1 %v943_v11  ;;  %341 = vmatpush.msrb.mxu0 %v1073_v62 }
  0x41   :  { %499 = vmatpush.msrb.mxu3 %v1107_v30  ;;  %424 = vmatpush.msrb.mxu2 %v955_v17 }
  0x42   :  { %384 = vmatpush.msrb.mxu1 %v955_v17  ;;  %345 = vmatpush.msrb.mxu0 %v1094_v12 }
  0x43   :  { %505 = vmatpush.msrb.mxu3 %v1124_v42  ;;  %426 = vmatpush.msrb.mxu2 %v977_v25 }
  0x44   :  { %386 = vmatpush.msrb.mxu1 %v977_v25  ;;  %349 = vmatpush.msrb.mxu0 %v1112_v32 }
  0x45   :  { %511 = vmatpush.msrb.mxu3 %v1137_v53  ;;  %428 = vmatpush.msrb.mxu2 %v983_v28 }
  0x46   :  { %388 = vmatpush.msrb.mxu1 %v983_v28  ;;  %353 = vmatpush.msrb.mxu0 %v1118_v39 }
  0x47   :  { %517 = vmatpush.msrb.mxu3 %v1151_v8  ;;  %430 = vmatpush.msrb.mxu2 %v1003_v35  ;;  %v813_v8 = vld [vmem:[%s1339_s2] ss:$0 sm:$0xff] }
  0x48   :  { %390 = vmatpush.msrb.mxu1 %v1003_v35  ;;  %357 = vmatpush.msrb.mxu0 %v1142_v61 }
  0x49   :  { %523 = vmatpush.msrb.mxu3 %v1162_v1  ;;  %432 = vmatpush.msrb.mxu2 %v1027_v45 }
  0x4a   :  { %392 = vmatpush.msrb.mxu1 %v1027_v45  ;;  %361 = vmatpush.msrb.mxu0 %v1156_v7 }
  0x4b   :  { %529 = vmatpush.msrb.mxu3 %v1173_v0  ;;  %434 = vmatpush.msrb.mxu2 %v1043_v51 }
  0x4c   :  { %394 = vmatpush.msrb.mxu1 %v1043_v51  ;;  %365 = vmatpush.msrb.mxu0 %v1167_v58 }
  0x4d   :  { %367 = vmatmul.f32.vlgmr.msrb.gmra.mxu0 %v1099_v18  ;;  %535 = vmatpush.msrb.mxu3 %v1181_v6 }
  0x4e   :  { %396 = vmatpush.msrb.mxu1 %v1050_v54  ;;  %555 = vmatpush.msra.mxu0 %v947_v14  ;;  %v1364_v14 = vld [vmem:[#allocation18_spill] sm:$0xff] }
  0x4f   :  { %541 = vmatpush.msrb.mxu3 %v1188_v31  ;;  %436 = vmatpush.msrb.mxu2 %v1050_v54  ;;  %v814_v31 = vld [vmem:[%s1340_s3] ss:$0 sm:$0xff] }
  0x50   :  { %398 = vmatpush.msrb.mxu1 %v1075_v63  ;;  %558 = vmatpush.msra.mxu0 %v950_v15 }
  0x51   :  { %547 = vmatpush.msrb.mxu3 %v1194_v44  ;;  %438 = vmatpush.msrb.mxu2 %v1075_v63 }
  0x52   :  { %400 = vmatpush.msrb.mxu1 %v1096_v13  ;;  %561 = vmatpush.msra.mxu0 %v953_v16 }
  0x53   :  { %716 = vmatpush.msra.mxu3 %v933_v3  ;;  %440 = vmatpush.msrb.mxu2 %v1096_v13 }
  0x54   :  { %402 = vmatpush.msrb.mxu1 %v1101_v26  ;;  %564 = vmatpush.msra.mxu0 %v959_v19 }
  0x55   :  { %404 = vmatmul.f32.vlgmr.msrb.gmra.mxu1 %v1099_v18  ;;  %718 = vmatpush.msra.mxu3 %v935_v4 }
  0x56   :  { %608 = vmatpush.msra.mxu1 %v933_v3  ;;  %567 = vmatpush.msra.mxu0 %v962_v20  ;;  %v1358_v3 = vld [vmem:[#allocation11_spill] sm:$0xff] }
  0x57   :  { %720 = vmatpush.msra.mxu3 %v937_v5  ;;  %442 = vmatpush.msrb.mxu2 %v1101_v26 }
  0x58   :  { %610 = vmatpush.msra.mxu1 %v935_v4  ;;  %570 = vmatpush.msra.mxu0 %v965_v21  ;;  %v1359_v4 = vld [vmem:[#allocation12_spill] sm:$0xff] }
  0x59   :  { %722 = vmatpush.msra.mxu3 %v939_v9  ;;  %649 = vmatpush.msra.mxu2 %v969_v22 }
  0x5a   :  { %612 = vmatpush.msra.mxu1 %v937_v5  ;;  %573 = vmatpush.msra.mxu0 %v986_v29  ;;  %v1360_v5 = vld [vmem:[#allocation13_spill] sm:$0xff] }
  0x5b   :  { %724 = vmatpush.msra.mxu3 %v941_v10  ;;  %653 = vmatpush.msra.mxu2 %v972_v23  ;;  %v1365_v29 = vld [vmem:[#allocation17_spill] sm:$0xff] }
  0x5c   :  { %614 = vmatpush.msra.mxu1 %v939_v9  ;;  %576 = vmatpush.msra.mxu0 %v1358_v3  ;;  %v1361_v9 = vld [vmem:[#allocation14_spill] sm:$0xff] }
  0x5d   :  { %726 = vmatpush.msra.mxu3 %v943_v11  ;;  %657 = vmatpush.msra.mxu2 %v975_v24 }
  0x5e   :  { %616 = vmatpush.msra.mxu1 %v941_v10  ;;  %579 = vmatpush.msra.mxu0 %v1359_v4  ;;  %v1362_v10 = vld [vmem:[#allocation15_spill] sm:$0xff] }
  0x5f   :  { %728 = vmatpush.msra.mxu3 %v955_v17  ;;  %661 = vmatpush.msra.mxu2 %v981_v27 }
  0x60   :  { %618 = vmatpush.msra.mxu1 %v943_v11  ;;  %582 = vmatpush.msra.mxu0 %v1360_v5  ;;  %v1363_v11 = vld [vmem:[#allocation16_spill] sm:$0xff] }
  0x61   :  { %730 = vmatpush.msra.mxu3 %v977_v25  ;;  %665 = vmatpush.msra.mxu2 %v997_v33 }
  0x62   :  { %620 = vmatpush.msra.mxu1 %v955_v17  ;;  %585 = vmatpush.msra.mxu0 %v1361_v9 }
  0x63   :  { %732 = vmatpush.msra.mxu3 %v983_v28  ;;  %669 = vmatpush.msra.mxu2 %v1001_v34 }
  0x64   :  { %622 = vmatpush.msra.mxu1 %v977_v25  ;;  %588 = vmatpush.msra.mxu0 %v1362_v10 }
  0x65   :  { %734 = vmatpush.msra.mxu3 %v1003_v35  ;;  %673 = vmatpush.msra.mxu2 %v1018_v41 }
  0x66   :  { %624 = vmatpush.msra.mxu1 %v983_v28  ;;  %591 = vmatpush.msra.mxu0 %v1363_v11 }
  0x67   :  { %736 = vmatpush.msra.mxu3 %v1027_v45  ;;  %677 = vmatpush.msra.mxu2 %v1041_v50 }
  0x68   :  { %626 = vmatpush.msra.mxu1 %v1003_v35  ;;  %594 = vmatpush.msra.mxu0 %v1364_v14 }
  0x69   :  { %738 = vmatpush.msra.mxu3 %v1043_v51  ;;  %681 = vmatpush.msra.mxu2 %v1059_v57 }
  0x6a   :  { %628 = vmatpush.msra.mxu1 %v1027_v45  ;;  %597 = vmatpush.msra.mxu0 %v1129_v47 }
  0x6b   :  { %740 = vmatpush.msra.mxu3 %v1050_v54  ;;  %685 = vmatpush.msra.mxu2 %v1073_v62 }
  0x6c   :  { %630 = vmatpush.msra.mxu1 %v1043_v51  ;;  %600 = vmatpush.msra.mxu0 %v1145_v60 }
  0x6d   :  { %742 = vmatpush.msra.mxu3 %v1075_v63  ;;  %689 = vmatpush.msra.mxu2 %v1094_v12 }
  0x6e   :  { %632 = vmatpush.msra.mxu1 %v1050_v54 }
  0x6f   :  { %744 = vmatpush.msra.mxu3 %v1096_v13  ;;  %693 = vmatpush.msra.mxu2 %v1112_v32 }
  0x70   :  { %634 = vmatpush.msra.mxu1 %v1075_v63 }
  0x71   :  { %746 = vmatpush.msra.mxu3 %v1101_v26  ;;  %697 = vmatpush.msra.mxu2 %v1118_v39 }
  0x72   :  { %636 = vmatpush.msra.mxu1 %v1096_v13 }
  0x73   :  { %701 = vmatpush.msra.mxu2 %v1142_v61 }
  0x74   :  { %638 = vmatpush.msra.mxu1 %v1101_v26 }
  0x75   :  { %705 = vmatpush.msra.mxu2 %v1156_v7 }
  0x77   :  { %709 = vmatpush.msra.mxu2 %v1167_v58 }
  0xae   :  { %v105_v16 = vpop.f32.mrf.mxu0 }
  0xb2   :  { %v206_v15 = vpop.f32.mrf.mxu1  ;;  %v299_v21 = vpop.f32.mrf.mxu3 }
  0xb3   :  { %v207_v17 = vadd.f32 %v206_v15, %v105_v16 }
  0xb4   :  { %v260_v19 = vpop.f32.mrf.mxu2 }
  0xb5   :  { %v261_v20 = vadd.f32 %v260_v19, %v207_v17 }
  0xb7   :  { %v300_v22 = vadd.f32 %v299_v21, %v261_v20 }
  0xca   :  { %v368_v23 = vpop.f32.mrf.mxu0 }
  0xcb   :  { %v369_v24 = vadd.f32 %v368_v23, %v300_v22 }
  0xd2   :  { %v405_v25 = vpop.f32.mrf.mxu1 }
  0xd3   :  { %v406_v27 = vadd.f32 %v405_v25, %v369_v24 }
  0xd5   :  { %v408_v28 = vmul.f32 0.03125, %v406_v27 }
  0xd7   :  { %v409_v33 = vsub.f32 %v1365_v29, %v408_v28 }
  0xd9   :  { %v410_v34 = vmul.f32 %v409_v33, %v409_v33 }
  0xdb   :  { %v443_v35 = vand.u32 4294901760, %v410_v34 }
  0xdd   :  { %v444_v37 = vsub.f32 %v410_v34, %v443_v35  ;;  %549 = vmatmul.f32.vlgmr.msrb.gmra.mxu3 %v443_v35 }
  0xdf   :  { %603 = vmatmul.f32.vlgmr.msra.gmra.mxu0 %v444_v37  ;;  %v445_v38 = vand.u32 4294901760, %v444_v37 }
  0xe1   :  { %642 = vmatmul.f32.vlgmr.msra.gmra.mxu1 %v445_v38  ;;  %v446_v40 = vsub.f32 %v444_v37, %v445_v38 }
  0xe3   :  { %v447_v41 = vand.u32 4294901760, %v446_v40 }
  0xe5   :  { %448 = vmatmul.f32.vlgmr.msrb.gmra.mxu2 %v447_v41  ;;  %748 = vmatmul.f32.vlgmr.msra.gmra.mxu3 %v443_v35 }
  0xed   :  { %711 = vmatmul.f32.vlgmr.msra.gmra.mxu2 %v443_v35 }
 0x15c   :  { %v604_v49 = vpop.f32.mrf.mxu0 }
 0x15e   :  { %v643_v51 = vpop.f32.mrf.mxu1 }
 0x160   :  { %v550_v43 = vpop.f32.mrf.mxu3 }
 0x168   :  { %v449_v45 = vpop.f32.mrf.mxu2  ;;  %v749_v57 = vpop.f32.mrf.mxu3 }
 0x169   :  { %v551_v46 = vadd.f32 %v550_v43, %v449_v45 }
 0x16b   :  { %v605_v50 = vadd.f32 %v604_v49, %v551_v46 }
 0x16d   :  { %v644_v52 = vadd.f32 %v643_v51, %v605_v50 }
 0x170   :  { %v712_v54 = vpop.f32.mrf.mxu2 }
 0x171   :  { %v713_v56 = vadd.f32 %v712_v54, %v644_v52 }
 0x173   :  { %v750_v58 = vadd.f32 %v749_v57, %v713_v56 }
 0x175   :  { %v752_v59 = vmul.f32 0.032258064, %v750_v58 }
 0x177   :  { %815 = vrsqrt.f32 %v752_v59  ;;  %vm760_vm0 = vcmp.eq.f32.partialorder %v752_v59, inf  ;;  %v763_v13 = vand.u32 2147483648, %v752_v59  ;;  %vm762_vm1 = vcmp.eq.f32.partialorder %v752_v59, 0.0 }
 0x17d   :  { %v816_v62 = vpop.eup %815 }
 0x17e   :  { %v754_v63 = vmul.f32 %v816_v62, %v752_v59 }
 0x180   :  { %v755_v0 = vmul.f32 %v816_v62, %v754_v63 }
 0x182   :  { %v756_v2 = vmul.f32 0.5, %v755_v0 }
 0x184   :  { %v757_v6 = vsub.f32 1.5, %v756_v2 }
 0x186   :  { %v758_v7 = vmul.f32 %v816_v62, %v757_v6 }
 0x188   :  { %v759_v12 = vmul.f32 %v758_v7, %v752_v59 }
 0x18a   :  { %v761_v18 = vsel %vm760_vm0, %v752_v59, %v759_v12 }
 0x18b   :  { %v764_v26 = vsel %vm762_vm1, %v763_v13, %v761_v18 }
 0x18c   :  { %v765_v30 = vadd.f32 1e-06, %v764_v26 }
 0x18e   :  { %817 = vrcp.f32 %v765_v30  ;;  %v777_v42 = vand.u32 2147483648, %v765_v30  ;;  %v775_v48 = vand.u32 2147483647, %v765_v30  ;;  %vm771_vm3 = vweird.f32 %v765_v30 }
 0x190   :  { %v778_v61 = vor.u32 1.1754944e-38, %v777_v42  ;;  %vm776_vm5 = vcmp.eq.f32.partialorder %v775_v48, 8.507059e+37 }
 0x194   :  { %v818_v32 = vpop.eup %817 }
 0x195   :  { %v767_v36 = vmul.f32 %v818_v32, %v765_v30  ;;  %vm772_vm2 = vweird.f32 %v818_v32 }
 0x196   :  { %vm773_vm4 = vmor %vm771_vm3, %vm772_vm2 }
 0x197   :  { %v768_v39 = vsub.f32 1.0, %v767_v36 }
 0x199   :  { %v769_v47 = vmul.f32 %v818_v32, %v768_v39 }
 0x19b   :  { %v770_v53 = vadd.f32 %v818_v32, %v769_v47 }
 0x19d   :  { %v774_v60 = vsel %vm773_vm4, %v818_v32, %v770_v53 }
 0x19e   :  { %v779_v1 = vsel %vm776_vm5, %v778_v61, %v774_v60 }
 0x19f   :  { %v780_v55 = vmul.f32 %v779_v1, %v409_v33 }
 0x1a1   :  { %v784_v44 = vmul.f32 %v813_v8, %v780_v55 }
 0x1a3   :  { %v788_v3 = vadd.f32 %v814_v31, %v784_v44 }
 0x1a5   :  { %789 = vst [vmem:[#allocation7] sm:$0xf] %v788_v3 }
 0x1a6   :  { %800 = dma.vmem_to_hbm [thread:$0]  %s796_s30, 64, %s798_s7, [#allocation4]  }
 0x1a7   :  { %895 = dma.done.wait [#allocation4], 64  }
 0x1a8   :  { %896 = vsyncadd [#allocation4], 4294967232 }
 0x1a9   :  { %805 = vsyncpa [#allocation3], 1 }
 0x1aa   :  { %806 = vsyncpa [#allocation6], 1 }
 0x1ab   :  { %807 = vsyncpa [#allocation4], 1 }

// kernel: tpu_custom_call.1
= control target key start
LH: loop header
LB: loop body
LE: loop exit
PB: predicated region body
PF: predicated region fallthrough
CT: control target
= control target key end

     0   :  { %8 = vsyncpa [#allocation3], 0  ;;  %s728_s0 = inlined_call_operand.hbm [shape: f32[16,32], index: 0, kind: input, shape index: {}]   ;;  %s729_s1 = inlined_call_operand.hbm [shape: f32[1,32], index: 1, kind: input, shape index: {}]   ;;  %s730_s2 = inlined_call_operand.vmem [shape: f32[1,32], index: 2, kind: input, shape index: {}]   ;;  %s731_s3 = inlined_call_operand.hbm [shape: f32[16,32], index: 3, kind: output, shape index: {}]  }
   0x1   :  { %10 = vsyncpa [#allocation3 + $0x1], 0 }
   0x2   :  { %11 = vsyncpa [#allocation6], 0 }
   0x3   :  { %12 = vsyncpa [#allocation4], 0 }
   0x4   :  { %14 = vsyncpa [#allocation4 + $0x1], 0  ;;  %s580_s12 = smov 0   ;;  %s582_s13 = smov 0  }
   0x5   :  { %s584_s14 = smov 0   ;;  %s586_s15 = smov 0  }
   0x6 LB: > { %s601_s16 = sadd.s32 4294967295, %s557_s15   ;;  %s350_s17 = sadd.s32 4294967294, %s557_s15   ;;  %s557_s15 = sphi %s586_s15, %s741_s15   ;;  %s553_s14 = sphi %s584_s14, %s740_s14   ;;  %s549_s13 = sphi %s582_s13, %s739_s13   ;;  %s545_s12 = sphi %s580_s12, %s738_s12  }
   0x7   : > { %p40_p0 = scmp.ne.s32.totalorder %s549_s13, %s545_s12  ;;  %p41_p1 = scmp.eq.s32.totalorder %s601_s16, 0 }
   0x8   : > { %p106_p2 = scmp.eq.s32.totalorder %s601_s16, 1  ;;  %p112_p3 = scmp.eq.s32.totalorder %s350_s17, 1 }
   0x9   : > { %p610_p4 = por %p41_p1, %p40_p0  ;;  %p351_p5 = scmp.ge.s32.totalorder %s557_s15, 1 }
   0xa   : > { %p615_p6 = por %p112_p3, %p40_p0  ;;  %p119_p7 = scmp.lt.s32.totalorder %s557_s15, 3 }
   0xb   : > { %s131_s22 = sshll.u32 %s729_s1, 4  ;;  %s559_s24 = smov [#allocation5]   ;;  %s132_s22 = int_to_ptr.hbm [resolvable:$true] %s131_s22 }
   0xc   : > { %p623_p8 = pnand %p351_p5, %p119_p7  ;;  %s133_s25 = sshll.u32 %s559_s24, 4  ;;  %s134_s25 = int_to_ptr.vmem [resolvable:$true] %s133_s25 }
   0xd   : > { %s633_s26 = sadd.s32 1, %s557_s15   ;;  %s27_s27 = sadd.s32 1, %s553_s14 }
   0xe   : > { %p372_p10 = pneg %p623_p8  ;;  %s24_s28 = ssub.s32 %s557_s15, %s633_s26 }
   0xf   : > { %p25_p12 = scmp.eq.s32.totalorder %s24_s28, 0  ;;  %p34_p13 = scmp.ne.s32.totalorder %s553_s14, %s549_s13 }
  0x10   : > { %p373_p11 = pnand %p372_p10, %p41_p1  ;;  %p35_p0 = scmp.eq.s32.totalorder %s557_s15, 0 }
  0x11   : > { %s642_s29 = scalar_select %p25_p12, %s553_s14, %s27_s27  }
  0x12   : > { %375 = dma.hbm_to_vmem [thread:$0]  (!%p373_p11), %s132_s22, 16, %s134_s25, [#allocation6]  }
  0x13   : > { %p646_p3 = por %p106_p2, %p34_p13  ;;  %p385_p5 = scmp.lt.s32.totalorder %s557_s15, 2 }
  0x14   : > { %s147_s4 = sand.u32 1, %s553_s14   ;;  %s355_s5 = sshll.u32 %s557_s15, 3 }
  0x15   : > { %p36_p7 = por %p35_p0, %p34_p13  ;;  %s354_s6 = sshll.u32 %s147_s4, 3 }
  0x16   : > { %s155_s9 = scalar_lea.hbm %s728_s0, %s355_s5  ;;  %s151_s11 = scalar_lea.vmem [#allocation2], %s354_s6 }
  0x17   : > { %s157_s10 = sshll.u32 %s155_s9, 4  ;;  %s159_s17 = sshll.u32 %s151_s11, 4  ;;  %s158_s10 = int_to_ptr.hbm [resolvable:$true] %s157_s10  ;;  %s160_s17 = int_to_ptr.vmem [resolvable:$true] %s159_s17 }
  0x18   : > { %p656_p10 = pnand %p385_p5, %p36_p7  ;;  %s148_s21 = scalar_lea.sflag [#allocation3], %s147_s4 }
  0x19   : > { %s457_s22 = sshra.s32 %s158_s10, 4  ;;  %s464_s28 = scalar_lea.hbm %s728_s0, 16  ;;  %s458_s22 = int_to_ptr.hbm [resolvable:$true] %s457_s22 }
  0x1a   : > { %s459_s24 = scalar_lea.hbm %s458_s22, 8  ;;  %p461_p11 = pneg %p656_p10 }
  0x1b   : > { %p460_p2 = scmp.ne.s32.totalorder %s458_s22, %s459_s24  ;;  %p465_p0 = scmp.lt.s32.totalorder %s458_s22, %s728_s0 }
  0x1c   : > { %p466_p5 = scmp.lt.s32.totalorder %s464_s28, %s459_s24 }
  0x1d   : > { %p462_p12 = pnand %p461_p11, %p460_p2 }
  0x1e   : > { %p467_p7 = por %p466_p5, %p465_p0 }
  0x1f   : > { %p463_p13 = pneg %p462_p12 }
  0x21   : > { %p468_p9 = pnand %p467_p7, %p463_p13 }
  0x23   : > { %471 = shalt.err (!%p468_p9)
}
  0x24   : > { %379 = dma.hbm_to_vmem [thread:$0]  (!%p656_p10), %s158_s10, 128, %s160_s17, %s148_s21  }
  0x25   : > { %168 = sbr.rel (%p623_p8) target bundleno = 337 (0x151), region = 32  ;;  %s673_s4 = sand.u32 (!%p623_p8), 1, %s549_s13  }
  0x26   : > { %s357_s7 = sshll.u32 (!%p623_p8), %s673_s4, 3  ;;  %s171_s8 = scalar_lea.sflag (!%p623_p8), [#allocation3], %s673_s4 }
  0x27   : > { %s174_s9 = scalar_lea.vmem (!%p623_p8), [#allocation2], %s357_s7 }
  0x2a   : > { %532 = dma.done.wait (%p610_p4), %s171_s8, 128  }
  0x2b   : > { %534 = vsyncadd (%p610_p4), %s171_s8, 4294967168 }
  0x2c   : > { %536 = dma.done.wait (%p41_p1), [#allocation6], 16  }
  0x2d   : > { %538 = vsyncadd (%p41_p1), [#allocation6], 4294967280  ;;  %vm206_vm0 = vcmask 261120   ;;  %v205_v0 = vld [vmem:[%s174_s9] sm:$0xff]  ;;  %s361_s18 = sshll.u32 %s601_s16, 3  ;;  %s202_s16 = scalar_lea.vmem [#allocation7], %s357_s7 }
  0x2e   : > { %v207_v1 = vsel %vm206_vm0, %v205_v0, 0.0  ;;  %v421_v29 = vld [vmem:[#allocation5] ss:$0 sm:$0xff]  ;;  %s265_s11 = scalar_lea.hbm %s731_s3, %s361_s18  ;;  %v422_v32 = vld [vmem:[%s730_s2] ss:$0 sm:$0xff]  ;;  %s267_s21 = sshll.u32 %s202_s16, 4  ;;  %s268_s21 = int_to_ptr.vmem [resolvable:$true] %s267_s21 }
  0x2f   : > { %208 = vadd.xlane.f32.xlu0 %v207_v1  ;;  %s269_s22 = sshll.u32 %s265_s11, 4  ;;  %s255_s24 = scalar_lea.sflag [#allocation4], %s673_s4  ;;  %s270_s22 = int_to_ptr.hbm [resolvable:$true] %s269_s22 }
  0x30   : > { %s501_s25 = sshra.s32 %s270_s22, 4  ;;  %s507_s6 = scalar_lea.hbm %s731_s3, 16  ;;  %s502_s25 = int_to_ptr.hbm [resolvable:$true] %s501_s25 }
  0x31   : > { %s503_s27 = scalar_lea.hbm %s502_s25, 8  ;;  %p508_p9 = scmp.lt.s32.totalorder %s502_s25, %s731_s3 }
  0x32   : > { %p504_p1 = scmp.ne.s32.totalorder %s502_s25, %s503_s27  ;;  %p509_p10 = scmp.lt.s32.totalorder %s507_s6, %s503_s27 }
  0x34   : > { %p505_p4 = pnand %p504_p1, %p646_p3  ;;  %p510_p2 = por %p509_p10, %p508_p9 }
  0x36   : > { %p506_p8 = pneg %p505_p4 }
  0x38   : > { %p511_p11 = pnand %p510_p2, %p506_p8 }
  0xa2   : > { %v209_v2 = vpop.xlane.xlu0 %208 }
  0xa3   : > { %v210_v3 = vmul.f32 0.03125, %v209_v2 }
  0xa5   : > { %v211_v4 = vsub.f32 %v205_v0, %v210_v3 }
  0xa7   : > { %v212_v5 = vmul.f32 %v211_v4, %v211_v4 }
  0xa9   : > { %v213_v6 = vsel %vm206_vm0, %v212_v5, 0.0 }
  0xaa   : > { %214 = vadd.xlane.f32.xlu0 %v213_v6 }
 0x11d   : > { %v215_v7 = vpop.xlane.xlu0 %214 }
 0x11e   : > { %v216_v8 = vmul.f32 0.032258064, %v215_v7 }
 0x120   : > { %423 = vrsqrt.f32 %v216_v8  ;;  %vm224_vm1 = vcmp.eq.f32.partialorder %v216_v8, inf  ;;  %v227_v16 = vand.u32 2147483648, %v216_v8  ;;  %vm226_vm2 = vcmp.eq.f32.partialorder %v216_v8, 0.0 }
 0x126   : > { %v424_v9 = vpop.eup %423 }
 0x127   : > { %v218_v10 = vmul.f32 %v424_v9, %v216_v8 }
 0x129   : > { %v219_v11 = vmul.f32 %v424_v9, %v218_v10 }
 0x12b   : > { %v220_v12 = vmul.f32 0.5, %v219_v11 }
 0x12d   : > { %v221_v13 = vsub.f32 1.5, %v220_v12 }
 0x12f   : > { %v222_v14 = vmul.f32 %v424_v9, %v221_v13 }
 0x131   : > { %v223_v15 = vmul.f32 %v222_v14, %v216_v8 }
 0x133   : > { %v225_v17 = vsel %vm224_vm1, %v216_v8, %v223_v15 }
 0x134   : > { %v228_v18 = vsel %vm226_vm2, %v227_v16, %v225_v17 }
 0x135   : > { %v229_v19 = vadd.f32 1e-06, %v228_v18 }
 0x137   : > { %425 = vrcp.f32 %v229_v19  ;;  %v241_v23 = vand.u32 2147483648, %v229_v19  ;;  %v239_v25 = vand.u32 2147483647, %v229_v19  ;;  %vm235_vm4 = vweird.f32 %v229_v19 }
 0x139   : > { %v242_v27 = vor.u32 1.1754944e-38, %v241_v23  ;;  %vm240_vm6 = vcmp.eq.f32.partialorder %v239_v25, 8.507059e+37 }
 0x13d   : > { %v426_v20 = vpop.eup %425 }
 0x13e   : > { %v231_v21 = vmul.f32 %v426_v20, %v229_v19  ;;  %vm236_vm3 = vweird.f32 %v426_v20 }
 0x13f   : > { %vm237_vm5 = vmor %vm235_vm4, %vm236_vm3 }
 0x140   : > { %v232_v22 = vsub.f32 1.0, %v231_v21 }
 0x142   : > { %v233_v24 = vmul.f32 %v426_v20, %v232_v22 }
 0x144   : > { %v234_v26 = vadd.f32 %v426_v20, %v233_v24 }
 0x146   : > { %v238_v28 = vsel %vm237_vm5, %v426_v20, %v234_v26 }
 0x147   : > { %v243_v30 = vsel %vm240_vm6, %v242_v27, %v238_v28 }
 0x148   : > { %v244_v31 = vmul.f32 %v243_v30, %v211_v4 }
 0x14a   : > { %v248_v33 = vmul.f32 %v421_v29, %v244_v31 }
 0x14c   : > { %v252_v34 = vadd.f32 %v422_v32, %v248_v33 }
 0x14e   : > { %253 = vst.msk [vmem:[%s202_s16] sm:$0xff] %vm206_vm0, %v252_v34 }
 0x14f   : > { %514 = shalt.err (!%p511_p11)
}
 0x150   : > { %370 = dma.vmem_to_hbm [thread:$0]  (%p646_p3), %s268_s21, 128, %s270_s22, %s255_s24  }
 0x151 PF: > { %s281_s4 = sand.u32 1, %s545_s12   ;;  %p737_p12 = scmp.ge.s32.totalorder %s557_s15, 2 }
 0x152   : > { %s282_s9 = scalar_lea.sflag [#allocation4], %s281_s4 }
 0x153   : > { %p381_p13 = pnand %p737_p12, %p615_p6 }
 0x155   : > { %p382_p0 = pneg %p381_p13 }
 0x157   : > { %540 = dma.done.wait (%p382_p0), %s282_s9, 128  }
 0x158   : > { %542 = vsyncadd (%p382_p0), %s282_s9, 4294967168  ;;  %p17_p5 = scmp.ge.s32.totalorder %s633_s26, 4   ;;  %s738_s12 = smov %s549_s13 }
 0x159   : > { %s739_s13 = smov %s553_s14  ;;  %s740_s14 = smov %s642_s29 }
 0x15a   : > { %s741_s15 = smov %s633_s26  ;;  %19 = sbr.rel (!%p17_p5) target bundleno = 6 (0x6), region = 81 }
 0x15f   :  { %288 = vsyncpa [#allocation3], 1 }
 0x160   :  { %290 = vsyncpa [#allocation3 + $0x1], 1 }
 0x161   :  { %291 = vsyncpa [#allocation6], 1 }
 0x162   :  { %292 = vsyncpa [#allocation4], 1 }
 0x163   :  { %294 = vsyncpa [#allocation4 + $0x1], 1 }

</bundles_post_ra>
